<compile_context>
chip_gen: v7x
topology: tpu7x:2x2x1
jax: 0.10.0
libtpu: 0.0.40
codegen_flags: <defaults>
</compile_context>

<pallas_src>
import functools

import jax
import jax.numpy as jnp
from jax.experimental import pallas as pl
from jax.experimental.pallas import tpu as pltpu


def _gin_ogb_kernel(n_valid_nodes, node_chunk,
                    scale_ref,      # SMEM (1,)          f32 : 1 + eps
                    bounds_ref,     # SMEM (n_tiles*4,)  i32 : per-tile windows
                    node_ref,       # VMEM (Np, Fp)      f32  (tail only)
                    nodeb_ref,      # VMEM (Np, Fp)      bf16 (gather)
                    edge_ref,       # VMEM (TE, Fep)     bf16
                    idx_ref,        # VMEM (TE, 2)       i32  [src, dst]
                    we_ref,         # VMEM (Fep, Fp)     bf16
                    w1_ref,         # VMEM (Fp, Hp)      bf16
                    w2_ref,         # VMEM (Hp, Fp)      bf16
                    vec_ref,        # VMEM (8, W)        f32  packed vectors
                    out_ref,        # VMEM (Np, Fp)      f32  (doubles as agg)
                    u_ref):         # VMEM scratch (TE, Fp) f32 gathered feats
    k = pl.program_id(0)
    NC = node_chunk

    @pl.when(k == 0)
    def _init():
        out_ref[...] = jnp.zeros_like(out_ref)

    TE = edge_ref.shape[0]
    Fp = out_ref.shape[1]
    Hp = w1_ref.shape[1]

    idx = idx_ref[...]                                   # (TE, 2)
    src = idx[:, 0:1]                                    # (TE, 1)
    dst = idx[:, 1:2]                                    # (TE, 1)

    # Per-tile node-chunk windows (precomputed in the wrapper, SMEM).
    base = k * 4
    src_c_lo = bounds_ref[base + 0]
    src_c_hi = bounds_ref[base + 1]
    dst_c_lo = bounds_ref[base + 2]
    dst_c_hi = bounds_ref[base + 3]

    vec = vec_ref[...]
    be = vec[0:1, 0:Fp]

    # project_in_edge_feats: Linear(Fe -> F); bf16 operands, f32 accumulate.
    # TODO(synk): fuse with the gather as one [edge | src_onehot] matmul.
    e_proj = jnp.dot(edge_ref[...], we_ref[...],
                     preferred_element_type=jnp.float32) + be       # (TE, Fp)

    # Gather of source-node features (copy_u) via chunked one-hot matmuls,
    # restricted to this tile's source-chunk window.
    u_ref[...] = jnp.zeros_like(u_ref)

    def _gather(c, carry):
        start = pl.multiple_of(c * NC, NC)
        col = jax.lax.broadcasted_iota(jnp.int32, (TE, NC), 1) + start
        src_oh = (col == src).astype(jnp.bfloat16)                  # (TE, NC)
        node_c = nodeb_ref[pl.ds(start, NC), :]                     # (NC, Fp)
        u_ref[...] += jnp.dot(src_oh, node_c,
                              preferred_element_type=jnp.float32)
        return carry

    jax.lax.fori_loop(src_c_lo, src_c_hi, _gather, 0)

    # Edge message: relu(edge_proj + gathered source feats).
    msg = jnp.maximum(e_proj + u_ref[...], 0.0).astype(jnp.bfloat16)  # (TE, Fp)

    # Scatter-sum into destination nodes: contract over the edge axis per node
    # chunk, restricted to this tile's destination-chunk window, accumulating
    # straight into the resident output block (dst = -1 padded edges have an
    # all-zero one-hot row and scatter nowhere).
    def _scatter(c, carry):
        start = pl.multiple_of(c * NC, NC)
        col = jax.lax.broadcasted_iota(jnp.int32, (TE, NC), 1) + start
        dst_oh = (col == dst).astype(jnp.bfloat16)                  # (TE, NC)
        part = jax.lax.dot_general(
            dst_oh, msg, dimension_numbers=(((0,), (0,)), ((), ())),
            preferred_element_type=jnp.float32)                     # (NC, Fp)
        out_ref[pl.ds(start, NC), :] += part
        return carry

    jax.lax.fori_loop(dst_c_lo, dst_c_hi, _scatter, 0)

    @pl.when(k == pl.num_programs(0) - 1)
    def _tail():
        scale = scale_ref[0]                                        # 1 + eps
        h = out_ref[...] + scale * node_ref[...]                    # (Np, Fp)

        b1 = vec[1:2, 0:Hp]
        gamma = vec[2:3, 0:Hp]
        beta = vec[3:4, 0:Hp]
        b2 = vec[4:5, 0:Fp]

        # project_out[0]: Linear(F -> 2F); bf16 operands, f32 accumulate.
        h1 = jnp.dot(h.astype(jnp.bfloat16), w1_ref[...],
                     preferred_element_type=jnp.float32) + b1       # (Np, Hp)

        # BatchNorm1d (training-mode batch statistics, biased variance),
        # one-pass stats; padded node rows excluded from the statistics.
        row_ids = jax.lax.broadcasted_iota(jnp.int32, h1.shape, 0)
        valid = row_ids < n_valid_nodes
        h1m = jnp.where(valid, h1, 0.0)
        inv_n = 1.0 / n_valid_nodes
        mean = jnp.sum(h1m, axis=0, keepdims=True) * inv_n
        ex2 = jnp.sum(h1m * h1m, axis=0, keepdims=True) * inv_n
        var = ex2 - mean * mean
        h1n = (h1 - mean) * jax.lax.rsqrt(var + 1e-5)
        h1n = jnp.maximum(h1n * gamma + beta, 0.0)                  # ReLU

        # project_out[3]: Linear(2F -> F); bf16 operands, f32 accumulate.
        out_ref[...] = jnp.dot(h1n.astype(jnp.bfloat16), w2_ref[...],
                               preferred_element_type=jnp.float32) + b2


def _round_up(x, m):
    return (x + m - 1) // m * m


def gin_ogb_layer(node_feats, edge_feats, src, dst, params, *,
                  edge_tile=1024, node_chunk=512):
    """Pallas-backed GINOGBLayer forward (one batched graph per call)."""
    N, F = node_feats.shape
    E, Fe = edge_feats.shape
    H = 2 * F

    f32 = jnp.float32
    bf16 = jnp.bfloat16

    # Lane-dense feature dims.
    Fp = _round_up(F, 128)
    Hp = _round_up(H, 128)
    Fep = _round_up(Fe, 128)

    # Node-chunk size (multiple of 16 for bf16 sublane packing); node rows are
    # padded to a whole number of chunks.
    NC = min(_round_up(int(node_chunk), 16), _round_up(N, 16))
    Np = _round_up(N, NC)

    # Edge tile (multiple of 16 for the bf16 edge-feature tiles).
    TE = min(_round_up(int(edge_tile), 16), _round_up(E, 16))
    Ep = _round_up(E, TE)
    n_tiles = Ep // TE

    # Sort edges by destination so each edge tile touches a narrow window of
    # destination chunks (and, for DGL-style batched graphs with contiguous
    # per-graph node ids, a narrow window of source chunks too). Sum
    # aggregation is permutation-invariant, so semantics are unchanged.
    order = jnp.argsort(dst.astype(jnp.int32))
    src_s = src.astype(jnp.int32)[order]
    dst_s = dst.astype(jnp.int32)[order]
    edge_s = edge_feats[order].astype(bf16)

    # Padding: padded edges get dst = -1 (their one-hot row is all-zero, so
    # they scatter nowhere) and src = last real src (so they don't widen the
    # per-tile gather window).
    src_p = jnp.full((Ep,), src_s[E - 1], jnp.int32).at[:E].set(src_s)
    dst_p = jnp.full((Ep,), -1, jnp.int32).at[:E].set(dst_s)
    idx = jnp.stack([src_p, dst_p], axis=1)                          # (Ep, 2)

    node_p32 = jnp.zeros((Np, Fp), f32).at[:N, :F].set(node_feats.astype(f32))
    node_pbf = node_p32.astype(bf16)
    edge_p = jnp.zeros((Ep, Fep), bf16).at[:E, :Fe].set(edge_s)

    we_p = jnp.zeros((Fep, Fp), bf16).at[:Fe, :F].set(params["we"].astype(bf16))
    w1_p = jnp.zeros((Fp, Hp), bf16).at[:F, :H].set(params["w1"].astype(bf16))
    w2_p = jnp.zeros((Hp, Fp), bf16).at[:H, :F].set(params["w2"].astype(bf16))

    # Pack all small per-feature vectors into a single (8, W) slab -> 1 DMA.
    W = max(Fp, Hp)
    vec = jnp.zeros((8, W), f32)
    vec = vec.at[0, :F].set(params["be"].astype(f32))
    vec = vec.at[1, :H].set(params["b1"].astype(f32))
    vec = vec.at[2, :H].set(params["gamma"].astype(f32))
    vec = vec.at[3, :H].set(params["beta"].astype(f32))
    vec = vec.at[4, :F].set(params["b2"].astype(f32))

    # Pre-fold (1 + eps) into an SMEM scalar.
    scale = jnp.reshape(1.0 + params["eps"].reshape(-1)[0], (1,)).astype(f32)

    # Per-tile [chunk_lo, chunk_hi) windows for the gather (src) and scatter
    # (dst) chunk loops, flattened to 1-D for compact SMEM residency.
    src_t = src_p.reshape(n_tiles, TE)
    dst_t = dst_p.reshape(n_tiles, TE)
    src_lo = jnp.min(src_t, axis=1) // NC
    src_hi = jnp.max(src_t, axis=1) // NC + 1
    dvalid = dst_t >= 0
    dst_lo = jnp.min(jnp.where(dvalid, dst_t, Np), axis=1) // NC
    dst_hi = jnp.max(jnp.where(dvalid, dst_t, -1), axis=1) // NC + 1
    bounds = jnp.stack([src_lo, src_hi, dst_lo, dst_hi], axis=1)
    bounds = bounds.reshape(-1).astype(jnp.int32)                    # (n_tiles*4,)

    # VMEM budget: resident blocks (assume double-buffered) + per-step
    # intermediates, clamped to 90% of the physical per-core VMEM
    # (v7x: 64 MiB, v5e/v6e: 128 MiB).
    resident = (2 * Np * Fp * 4            # out block (agg accumulator)
                + 2 * Np * Fp * 4          # node f32
                + 2 * Np * Fp * 2          # node bf16
                + 2 * TE * Fep * 2         # edge tiles
                + 2 * TE * 128 * 4         # idx tiles (lane-padded)
                + 2 * Fep * Fp * 2         # we
                + 2 * Fp * Hp * 2          # w1
                + 2 * Hp * Fp * 2          # w2
                + 2 * 8 * W * 4            # packed vectors
                + TE * Fp * 4)             # gathered-u scratch
    transient = TE * Fp * 12 + TE * NC * 8 + NC * Fp * 4 + Np * Hp * 8
    try:
        vmem_cap = int(pltpu.get_tpu_info().vmem_capacity_bytes)
    except Exception:
        vmem_cap = 64 * 1024 * 1024
    vmem_limit = int(min(max(1.3 * (resident + transient), 32 * 1024 * 1024),
                         0.9 * vmem_cap))

    kernel = functools.partial(_gin_ogb_kernel, N, NC)

    out = pl.pallas_call(
        kernel,
        out_shape=jax.ShapeDtypeStruct((Np, Fp), f32),
        grid=(n_tiles,),
        in_specs=[
            pl.BlockSpec(memory_space=pltpu.MemorySpace.SMEM),       # scale
            pl.BlockSpec(memory_space=pltpu.MemorySpace.SMEM),       # bounds
            pl.BlockSpec((Np, Fp), lambda k: (0, 0)),                # node f32
            pl.BlockSpec((Np, Fp), lambda k: (0, 0)),                # node bf16
            pl.BlockSpec((TE, Fep), lambda k: (k, 0)),               # edge tile
            pl.BlockSpec((TE, 2), lambda k: (k, 0)),                 # [src, dst]
            pl.BlockSpec((Fep, Fp), lambda k: (0, 0)),               # we
            pl.BlockSpec((Fp, Hp), lambda k: (0, 0)),                # w1
            pl.BlockSpec((Hp, Fp), lambda k: (0, 0)),                # w2
            pl.BlockSpec((8, W), lambda k: (0, 0)),                  # vectors
        ],
        out_specs=pl.BlockSpec((Np, Fp), lambda k: (0, 0)),
        scratch_shapes=[pltpu.VMEM((TE, Fp), jnp.float32)],          # gathered u
        compiler_params=pltpu.CompilerParams(
            dimension_semantics=("arbitrary",),
            vmem_limit_bytes=vmem_limit,
        ),
    )(scale, bounds, node_p32, node_pbf, edge_p, idx, we_p, w1_p, w2_p, vec)

    return out[:N, :F]


def _reference(node_feats, edge_feats, src, dst, params):
    """Plain-JAX f32 reference for validation."""
    N, F = node_feats.shape
    e_proj = edge_feats @ params["we"] + params["be"]
    msg = jnp.maximum(e_proj + node_feats[src], 0.0)
    agg = jnp.zeros((N, F), jnp.float32).at[dst].add(msg)
    h = agg + (1.0 + params["eps"][0]) * node_feats
    h1 = h @ params["w1"] + params["b1"]
    mean = jnp.mean(h1, axis=0, keepdims=True)
    var = jnp.mean((h1 - mean) ** 2, axis=0, keepdims=True)
    h1 = (h1 - mean) / jnp.sqrt(var + 1e-5)
    h1 = jnp.maximum(h1 * params["gamma"] + params["beta"], 0.0)
    return h1 @ params["w2"] + params["b2"]


def _init_params(key, node_feats, in_edge_feats):
    """Deterministic parameter init (shapes from GINOGBLayer.__init__)."""
    F, Fe = node_feats, in_edge_feats
    ks = jax.random.split(key, 6)
    scale_e = 1.0 / jnp.sqrt(Fe)
    scale_1 = 1.0 / jnp.sqrt(F)
    scale_2 = 1.0 / jnp.sqrt(2 * F)
    return {
        "we": jax.random.uniform(ks[0], (Fe, F), jnp.float32, -scale_e, scale_e),
        "be": jax.random.uniform(ks[1], (F,), jnp.float32, -scale_e, scale_e),
        "eps": jnp.zeros((1,), jnp.float32),
        "w1": jax.random.uniform(ks[2], (F, 2 * F), jnp.float32, -scale_1, scale_1),
        "b1": jax.random.uniform(ks[3], (2 * F,), jnp.float32, -scale_1, scale_1),
        "gamma": jnp.ones((2 * F,), jnp.float32),
        "beta": jnp.zeros((2 * F,), jnp.float32),
        "w2": jax.random.uniform(ks[4], (2 * F, F), jnp.float32, -scale_2, scale_2),
        "b2": jax.random.uniform(ks[5], (F,), jnp.float32, -scale_2, scale_2),
    }


if __name__ == "__main__":
    key = jax.random.PRNGKey(0)
    k_node, k_edge, k_src, k_dst, k_param = jax.random.split(key, 5)

    # Small sizes chosen to exercise node-row padding (30 -> 32), the chunked
    # node loops (node_chunk=16 -> 2 chunks, with per-tile windows that skip
    # chunks once edges are sorted by dst), and edge padding / multi-step
    # edge tiling (50 -> 64 with edge_tile=16, grid=(4,)).
    N = 30            # total nodes in the batch of graphs
    E = 50            # total edges
    NODE_FEATS = 32
    IN_EDGE_FEATS = 16

    node_feats = jax.random.normal(k_node, (N, NODE_FEATS), jnp.float32)
    edge_feats = jax.random.normal(k_edge, (E, IN_EDGE_FEATS), jnp.float32)
    src = jax.random.randint(k_src, (E,), 0, N, jnp.int32)
    dst = jax.random.randint(k_dst, (E,), 0, N, jnp.int32)

    params = _init_params(k_param, NODE_FEATS, IN_EDGE_FEATS)

    out = gin_ogb_layer(node_feats, edge_feats, src, dst, params,
                        edge_tile=16, node_chunk=16)
    out = jax.block_until_ready(out)

    ref = _reference(node_feats, edge_feats, src, dst, params)
    assert out.shape == (N, NODE_FEATS)
    # End-to-end bf16 MXU operands (message passing + MLP tail) with f32
    # accumulation -> compare against the f32 reference at a correspondingly
    # relaxed tolerance.
    err = float(jnp.max(jnp.abs(out - ref)))
    assert jnp.allclose(out, ref, atol=1e-1, rtol=1e-1), (
        f"mismatch vs reference, max abs err = {err}")

    print("KERNEL_OK")
</pallas_src>

<mosaic_0001>
module attributes {stable_mosaic.version = 11 : i64} {
  func.func @_gin_ogb_kernel(%arg0: i32, %arg1: memref<1xf32, #tpu.memory_space<smem>>, %arg2: memref<16xi32, #tpu.memory_space<smem>>, %arg3: memref<32x128xf32, #tpu.memory_space<vmem>>, %arg4: memref<32x128xbf16, #tpu.memory_space<vmem>>, %arg5: memref<16x128xbf16, #tpu.memory_space<vmem>>, %arg6: memref<16x2xi32, #tpu.memory_space<vmem>>, %arg7: memref<128x128xbf16, #tpu.memory_space<vmem>>, %arg8: memref<128x128xbf16, #tpu.memory_space<vmem>>, %arg9: memref<128x128xbf16, #tpu.memory_space<vmem>>, %arg10: memref<8x128xf32, #tpu.memory_space<vmem>>, %arg11: memref<32x128xf32, #tpu.memory_space<vmem>>, %arg12: memref<16x128xf32, #tpu.memory_space<vmem>>) attributes {dimension_semantics = [#tpu.dimension_semantics<arbitrary>], iteration_bounds = array<i64: 4>, scalar_prefetch = 0 : i64, scratch_operands = 1 : i64, tpu.core_type = #tpu.core_type<tc>, window_params = [{transform_indices = @transform_0, window_bounds = array<i64: 1>}, {transform_indices = @transform_1, window_bounds = array<i64: 16>}, {pipeline_mode = #tpu.pipeline_mode<synchronous>, transform_indices = @transform_2, window_bounds = array<i64: 32, 128>}, {pipeline_mode = #tpu.pipeline_mode<synchronous>, transform_indices = @transform_3, window_bounds = array<i64: 32, 128>}, {transform_indices = @transform_4, window_bounds = array<i64: 16, 128>}, {transform_indices = @transform_5, window_bounds = array<i64: 16, 2>}, {pipeline_mode = #tpu.pipeline_mode<synchronous>, transform_indices = @transform_6, window_bounds = array<i64: 128, 128>}, {pipeline_mode = #tpu.pipeline_mode<synchronous>, transform_indices = @transform_7, window_bounds = array<i64: 128, 128>}, {pipeline_mode = #tpu.pipeline_mode<synchronous>, transform_indices = @transform_8, window_bounds = array<i64: 128, 128>}, {pipeline_mode = #tpu.pipeline_mode<synchronous>, transform_indices = @transform_9, window_bounds = array<i64: 8, 128>}, {pipeline_mode = #tpu.pipeline_mode<synchronous>, transform_indices = @transform_10, window_bounds = array<i64: 32, 128>}]} {
    %c0_i32 = arith.constant 0 : i32
    %0 = arith.cmpi eq, %arg0, %c0_i32 : i32
    %1 = arith.extui %0 : i1 to i32
    %c0_i32_0 = arith.constant 0 : i32
    %2 = arith.cmpi ne, %1, %c0_i32_0 : i32
    scf.if %2 {
      %cst_21 = arith.constant 0.000000e+00 : f32
      %40 = vector.broadcast %cst_21 : f32 to vector<32x128xf32>
      %c0_22 = arith.constant 0 : index
      %c0_23 = arith.constant 0 : index
      %41 = vector.load %arg11[%c0_22, %c0_23] : memref<32x128xf32, #tpu.memory_space<vmem>>, vector<32x128xf32>
      tpu.vector_store %arg11[%c0_22, %c0_23], %40 {strides = array<i32>} : memref<32x128xf32, #tpu.memory_space<vmem>>, vector<32x128xf32>,
    } else {
    }
    %c0 = arith.constant 0 : index
    %c0_1 = arith.constant 0 : index
    %3 = vector.load %arg6[%c0, %c0_1] : memref<16x2xi32, #tpu.memory_space<vmem>>, vector<16x2xi32>
    %4 = vector.extract_strided_slice %3 {offsets = [0, 0], sizes = [16, 1], strides = [1, 1]} : vector<16x2xi32> to vector<16x1xi32>
    %5 = vector.extract_strided_slice %3 {offsets = [0, 1], sizes = [16, 1], strides = [1, 1]} : vector<16x2xi32> to vector<16x1xi32>
    %c4_i32 = arith.constant 4 : i32
    %6 = arith.muli %arg0, %c4_i32 : i32
    %c0_i32_2 = arith.constant 0 : i32
    %7 = arith.addi %6, %c0_i32_2 : i32
    %8 = arith.index_cast %7 : i32 to index
    %9 = memref.load %arg2[%8] : memref<16xi32, #tpu.memory_space<smem>>
    %c1_i32 = arith.constant 1 : i32
    %10 = arith.addi %6, %c1_i32 : i32
    %11 = arith.index_cast %10 : i32 to index
    %12 = memref.load %arg2[%11] : memref<16xi32, #tpu.memory_space<smem>>
    %c2_i32 = arith.constant 2 : i32
    %13 = arith.addi %6, %c2_i32 : i32
    %14 = arith.index_cast %13 : i32 to index
    %15 = memref.load %arg2[%14] : memref<16xi32, #tpu.memory_space<smem>>
    %c3_i32 = arith.constant 3 : i32
    %16 = arith.addi %6, %c3_i32 : i32
    %17 = arith.index_cast %16 : i32 to index
    %18 = memref.load %arg2[%17] : memref<16xi32, #tpu.memory_space<smem>>
    %c0_3 = arith.constant 0 : index
    %c0_4 = arith.constant 0 : index
    %19 = vector.load %arg10[%c0_3, %c0_4] : memref<8x128xf32, #tpu.memory_space<vmem>>, vector<8x128xf32>
    %20 = vector.extract_strided_slice %19 {offsets = [0, 0], sizes = [1, 128], strides = [1, 1]} : vector<8x128xf32> to vector<1x128xf32>
    %c0_5 = arith.constant 0 : index
    %c0_6 = arith.constant 0 : index
    %21 = vector.load %arg5[%c0_5, %c0_6] : memref<16x128xbf16, #tpu.memory_space<vmem>>, vector<16x128xbf16>
    %c0_7 = arith.constant 0 : index
    %c0_8 = arith.constant 0 : index
    %22 = vector.load %arg7[%c0_7, %c0_8] : memref<128x128xbf16, #tpu.memory_space<vmem>>, vector<128x128xbf16>
    %cst = arith.constant dense<0.000000e+00> : vector<16x128xf32>
    %23 = tpu.matmul %21, %22, %cst {dimension_numbers = #tpu.dot_dimension_numbers<[1], [0], [0], [1], [0, 0, 1, 1], [], []>} : vector<16x128xbf16>, vector<128x128xbf16>, vector<16x128xf32> -> vector<16x128xf32>
    %24 = vector.broadcast %20 : vector<1x128xf32> to vector<16x128xf32>
    %25 = arith.addf %23, %24 : vector<16x128xf32>
    %cst_9 = arith.constant 0.000000e+00 : f32
    %26 = vector.broadcast %cst_9 : f32 to vector<16x128xf32>
    %c0_10 = arith.constant 0 : index
    %c0_11 = arith.constant 0 : index
    %27 = vector.load %arg12[%c0_10, %c0_11] : memref<16x128xf32, #tpu.memory_space<vmem>>, vector<16x128xf32>
    tpu.vector_store %arg12[%c0_10, %c0_11], %26 {strides = array<i32>} : memref<16x128xf32, #tpu.memory_space<vmem>>, vector<16x128xf32>,
    %c0_i32_12 = arith.constant 0 : i32
    %28 = arith.subi %12, %9 : i32
    %29 = arith.addi %9, %28 : i32
    %c1_i32_13 = arith.constant 1 : i32
    scf.for %arg13 = %9 to %29 step %c1_i32_13  : i32 {
      %c16_i32 = arith.constant 16 : i32
      %40 = arith.muli %arg13, %c16_i32 : i32
      %41 = tpu.assume_multiple %40, 16 : i32
      %42 = tpu.iota {dimensions = array<i32: 1>} : vector<16x16xi32>
      %43 = vector.broadcast %41 : i32 to vector<16x16xi32>
      %44 = arith.addi %42, %43 : vector<16x16xi32>
      %45 = vector.broadcast %4 : vector<16x1xi32> to vector<16x16xi32>
      %46 = arith.cmpi eq, %44, %45 : vector<16x16xi32>
      %47 = arith.extui %46 : vector<16x16xi1> to vector<16x16xi32>
      %48 = arith.sitofp %47 : vector<16x16xi32> to vector<16x16xf32>
      %49 = arith.truncf %48 : vector<16x16xf32> to vector<16x16xbf16>
      %50 = arith.index_cast %41 : i32 to index
      %c0_21 = arith.constant 0 : index
      %51 = vector.load %arg4[%50, %c0_21] : memref<32x128xbf16, #tpu.memory_space<vmem>>, vector<16x128xbf16>
      %c0_22 = arith.constant 0 : index
      %c0_23 = arith.constant 0 : index
      %52 = vector.load %arg12[%c0_22, %c0_23] : memref<16x128xf32, #tpu.memory_space<vmem>>, vector<16x128xf32>
      %cst_24 = arith.constant dense<0.000000e+00> : vector<16x128xf32>
      %53 = tpu.matmul %49, %51, %cst_24 {dimension_numbers = #tpu.dot_dimension_numbers<[1], [0], [0], [1], [0, 0, 1, 1], [], []>} : vector<16x16xbf16>, vector<16x128xbf16>, vector<16x128xf32> -> vector<16x128xf32>
      %54 = arith.addf %52, %53 : vector<16x128xf32>
      %c0_25 = arith.constant 0 : index
      %c0_26 = arith.constant 0 : index
      %55 = vector.load %arg12[%c0_25, %c0_26] : memref<16x128xf32, #tpu.memory_space<vmem>>, vector<16x128xf32>
      tpu.vector_store %arg12[%c0_25, %c0_26], %54 {strides = array<i32>} : memref<16x128xf32, #tpu.memory_space<vmem>>, vector<16x128xf32>,
    }
    %c0_14 = arith.constant 0 : index
    %c0_15 = arith.constant 0 : index
    %30 = vector.load %arg12[%c0_14, %c0_15] : memref<16x128xf32, #tpu.memory_space<vmem>>, vector<16x128xf32>
    %31 = arith.addf %25, %30 : vector<16x128xf32>
    %cst_16 = arith.constant 0.000000e+00 : f32
    %32 = vector.broadcast %cst_16 : f32 to vector<16x128xf32>
    %33 = arith.maximumf %31, %32 : vector<16x128xf32>
    %34 = arith.truncf %33 : vector<16x128xf32> to vector<16x128xbf16>
    %c0_i32_17 = arith.constant 0 : i32
    %35 = arith.subi %18, %15 : i32
    %36 = arith.addi %15, %35 : i32
    %c1_i32_18 = arith.constant 1 : i32
    scf.for %arg13 = %15 to %36 step %c1_i32_18  : i32 {
      %c16_i32 = arith.constant 16 : i32
      %40 = arith.muli %arg13, %c16_i32 : i32
      %41 = tpu.assume_multiple %40, 16 : i32
      %42 = tpu.iota {dimensions = array<i32: 1>} : vector<16x16xi32>
      %43 = vector.broadcast %41 : i32 to vector<16x16xi32>
      %44 = arith.addi %42, %43 : vector<16x16xi32>
      %45 = vector.broadcast %5 : vector<16x1xi32> to vector<16x16xi32>
      %46 = arith.cmpi eq, %44, %45 : vector<16x16xi32>
      %47 = arith.extui %46 : vector<16x16xi1> to vector<16x16xi32>
      %48 = arith.sitofp %47 : vector<16x16xi32> to vector<16x16xf32>
      %49 = arith.truncf %48 : vector<16x16xf32> to vector<16x16xbf16>
      %cst_21 = arith.constant dense<0.000000e+00> : vector<16x128xf32>
      %50 = tpu.matmul %49, %34, %cst_21 {dimension_numbers = #tpu.dot_dimension_numbers<[0], [0], [1], [1], [0, 1, 1, 1], [], []>} : vector<16x16xbf16>, vector<16x128xbf16>, vector<16x128xf32> -> vector<16x128xf32>
      %51 = arith.index_cast %41 : i32 to index
      %c0_22 = arith.constant 0 : index
      %52 = vector.load %arg11[%51, %c0_22] : memref<32x128xf32, #tpu.memory_space<vmem>>, vector<16x128xf32>
      %53 = arith.addf %52, %50 : vector<16x128xf32>
      %54 = arith.index_cast %41 : i32 to index
      %c0_23 = arith.constant 0 : index
      %55 = vector.load %arg11[%54, %c0_23] : memref<32x128xf32, #tpu.memory_space<vmem>>, vector<16x128xf32>
      tpu.vector_store %arg11[%54, %c0_23], %53 {strides = array<i32>} : memref<32x128xf32, #tpu.memory_space<vmem>>, vector<16x128xf32>,
    }
    %c3_i32_19 = arith.constant 3 : i32
    %37 = arith.cmpi eq, %arg0, %c3_i32_19 : i32
    %38 = arith.extui %37 : i1 to i32
    %c0_i32_20 = arith.constant 0 : i32
    %39 = arith.cmpi ne, %38, %c0_i32_20 : i32
    scf.if %39 {
      %c0_21 = arith.constant 0 : index
      %40 = memref.load %arg1[%c0_21] : memref<1xf32, #tpu.memory_space<smem>>
      %c0_22 = arith.constant 0 : index
      %c0_23 = arith.constant 0 : index
      %41 = vector.load %arg11[%c0_22, %c0_23] : memref<32x128xf32, #tpu.memory_space<vmem>>, vector<32x128xf32>
      %c0_24 = arith.constant 0 : index
      %c0_25 = arith.constant 0 : index
      %42 = vector.load %arg3[%c0_24, %c0_25] : memref<32x128xf32, #tpu.memory_space<vmem>>, vector<32x128xf32>
      %43 = vector.broadcast %40 : f32 to vector<32x128xf32>
      %44 = arith.mulf %43, %42 : vector<32x128xf32>
      %45 = arith.addf %41, %44 : vector<32x128xf32>
      %46 = vector.extract_strided_slice %19 {offsets = [1, 0], sizes = [1, 128], strides = [1, 1]} : vector<8x128xf32> to vector<1x128xf32>
      %47 = vector.extract_strided_slice %19 {offsets = [2, 0], sizes = [1, 128], strides = [1, 1]} : vector<8x128xf32> to vector<1x128xf32>
      %48 = vector.extract_strided_slice %19 {offsets = [3, 0], sizes = [1, 128], strides = [1, 1]} : vector<8x128xf32> to vector<1x128xf32>
      %49 = vector.extract_strided_slice %19 {offsets = [4, 0], sizes = [1, 128], strides = [1, 1]} : vector<8x128xf32> to vector<1x128xf32>
      %50 = arith.truncf %45 : vector<32x128xf32> to vector<32x128xbf16>
      %c0_26 = arith.constant 0 : index
      %c0_27 = arith.constant 0 : index
      %51 = vector.load %arg8[%c0_26, %c0_27] : memref<128x128xbf16, #tpu.memory_space<vmem>>, vector<128x128xbf16>
      %cst_28 = arith.constant dense<0.000000e+00> : vector<32x128xf32>
      %52 = tpu.matmul %50, %51, %cst_28 {dimension_numbers = #tpu.dot_dimension_numbers<[1], [0], [0], [1], [0, 0, 1, 1], [], []>} : vector<32x128xbf16>, vector<128x128xbf16>, vector<32x128xf32> -> vector<32x128xf32>
      %53 = vector.broadcast %46 : vector<1x128xf32> to vector<32x128xf32>
      %54 = arith.addf %52, %53 : vector<32x128xf32>
      %55 = tpu.iota {dimensions = array<i32: 0>} : vector<32x128xi32>
      %c30_i32 = arith.constant 30 : i32
      %56 = vector.broadcast %c30_i32 : i32 to vector<32x128xi32>
      %57 = arith.cmpi slt, %55, %56 : vector<32x128xi32>
      %cst_29 = arith.constant 0.000000e+00 : f32
      %58 = vector.broadcast %cst_29 : f32 to vector<32x128xf32>
      %59 = arith.select %57, %54, %58 : vector<32x128xi1>, vector<32x128xf32>
      %cst_30 = arith.constant dense<0.000000e+00> : vector<128xf32>
      %60 = vector.multi_reduction <add>, %59, %cst_30 [0] : vector<32x128xf32> to vector<128xf32>
      %61 = vector.shape_cast %60 : vector<128xf32> to vector<1x128xf32>
      %cst_31 = arith.constant 0.0333333351 : f32
      %62 = vector.broadcast %cst_31 : f32 to vector<1x128xf32>
      %63 = arith.mulf %61, %62 : vector<1x128xf32>
      %64 = arith.mulf %59, %59 : vector<32x128xf32>
      %cst_32 = arith.constant dense<0.000000e+00> : vector<128xf32>
      %65 = vector.multi_reduction <add>, %64, %cst_32 [0] : vector<32x128xf32> to vector<128xf32>
      %66 = vector.shape_cast %65 : vector<128xf32> to vector<1x128xf32>
      %cst_33 = arith.constant 0.0333333351 : f32
      %67 = vector.broadcast %cst_33 : f32 to vector<1x128xf32>
      %68 = arith.mulf %66, %67 : vector<1x128xf32>
      %69 = arith.mulf %63, %63 : vector<1x128xf32>
      %70 = arith.subf %68, %69 : vector<1x128xf32>
      %71 = vector.broadcast %63 : vector<1x128xf32> to vector<32x128xf32>
      %72 = arith.subf %54, %71 : vector<32x128xf32>
      %cst_34 = arith.constant 9.99999974E-6 : f32
      %73 = vector.broadcast %cst_34 : f32 to vector<1x128xf32>
      %74 = arith.addf %70, %73 : vector<1x128xf32>
      %75 = math.rsqrt %74 : vector<1x128xf32>
      %76 = vector.broadcast %75 : vector<1x128xf32> to vector<32x128xf32>
      %77 = arith.mulf %72, %76 : vector<32x128xf32>
      %78 = vector.broadcast %47 : vector<1x128xf32> to vector<32x128xf32>
      %79 = arith.mulf %77, %78 : vector<32x128xf32>
      %80 = vector.broadcast %48 : vector<1x128xf32> to vector<32x128xf32>
      %81 = arith.addf %79, %80 : vector<32x128xf32>
      %cst_35 = arith.constant 0.000000e+00 : f32
      %82 = vector.broadcast %cst_35 : f32 to vector<32x128xf32>
      %83 = arith.maximumf %81, %82 : vector<32x128xf32>
      %84 = arith.truncf %83 : vector<32x128xf32> to vector<32x128xbf16>
      %c0_36 = arith.constant 0 : index
      %c0_37 = arith.constant 0 : index
      %85 = vector.load %arg9[%c0_36, %c0_37] : memref<128x128xbf16, #tpu.memory_space<vmem>>, vector<128x128xbf16>
      %cst_38 = arith.constant dense<0.000000e+00> : vector<32x128xf32>
      %86 = tpu.matmul %84, %85, %cst_38 {dimension_numbers = #tpu.dot_dimension_numbers<[1], [0], [0], [1], [0, 0, 1, 1], [], []>} : vector<32x128xbf16>, vector<128x128xbf16>, vector<32x128xf32> -> vector<32x128xf32>
      %87 = vector.broadcast %49 : vector<1x128xf32> to vector<32x128xf32>
      %88 = arith.addf %86, %87 : vector<32x128xf32>
      %c0_39 = arith.constant 0 : index
      %c0_40 = arith.constant 0 : index
      %89 = vector.load %arg11[%c0_39, %c0_40] : memref<32x128xf32, #tpu.memory_space<vmem>>, vector<32x128xf32>
      tpu.vector_store %arg11[%c0_39, %c0_40], %88 {strides = array<i32>} : memref<32x128xf32, #tpu.memory_space<vmem>>, vector<32x128xf32>,
    } else {
    }
    return
  }
  func.func @transform_0(%arg0: i32) -> i32 {
    %c0_i32 = arith.constant 0 : i32
    %c0_i32_0 = arith.constant 0 : i32
    return %c0_i32 : i32
  }
  func.func @transform_1(%arg0: i32) -> i32 {
    %c0_i32 = arith.constant 0 : i32
    %c0_i32_0 = arith.constant 0 : i32
    return %c0_i32 : i32
  }
  func.func @transform_2(%arg0: i32) -> (i32, i32) {
    %c0_i32 = arith.constant 0 : i32
    %c0_i32_0 = arith.constant 0 : i32
    %c0_i32_1 = arith.constant 0 : i32
    return %c0_i32, %c0_i32_0 : i32, i32
  }
  func.func @transform_3(%arg0: i32) -> (i32, i32) {
    %c0_i32 = arith.constant 0 : i32
    %c0_i32_0 = arith.constant 0 : i32
    %c0_i32_1 = arith.constant 0 : i32
    return %c0_i32, %c0_i32_0 : i32, i32
  }
  func.func @transform_4(%arg0: i32) -> (i32, i32) {
    %c0_i32 = arith.constant 0 : i32
    %c0_i32_0 = arith.constant 0 : i32
    return %arg0, %c0_i32 : i32, i32
  }
  func.func @transform_5(%arg0: i32) -> (i32, i32) {
    %c0_i32 = arith.constant 0 : i32
    %c0_i32_0 = arith.constant 0 : i32
    return %arg0, %c0_i32 : i32, i32
  }
  func.func @transform_6(%arg0: i32) -> (i32, i32) {
    %c0_i32 = arith.constant 0 : i32
    %c0_i32_0 = arith.constant 0 : i32
    %c0_i32_1 = arith.constant 0 : i32
    return %c0_i32, %c0_i32_0 : i32, i32
  }
  func.func @transform_7(%arg0: i32) -> (i32, i32) {
    %c0_i32 = arith.constant 0 : i32
    %c0_i32_0 = arith.constant 0 : i32
    %c0_i32_1 = arith.constant 0 : i32
    return %c0_i32, %c0_i32_0 : i32, i32
  }
  func.func @transform_8(%arg0: i32) -> (i32, i32) {
    %c0_i32 = arith.constant 0 : i32
    %c0_i32_0 = arith.constant 0 : i32
    %c0_i32_1 = arith.constant 0 : i32
    return %c0_i32, %c0_i32_0 : i32, i32
  }
  func.func @transform_9(%arg0: i32) -> (i32, i32) {
    %c0_i32 = arith.constant 0 : i32
    %c0_i32_0 = arith.constant 0 : i32
    %c0_i32_1 = arith.constant 0 : i32
    return %c0_i32, %c0_i32_0 : i32, i32
  }
  func.func @transform_10(%arg0: i32) -> (i32, i32) {
    %c0_i32 = arith.constant 0 : i32
    %c0_i32_0 = arith.constant 0 : i32
    %c0_i32_1 = arith.constant 0 : i32
    return %c0_i32, %c0_i32_0 : i32, i32
  }
}

</mosaic_0001>

<bundles_post_ra>
// kernel: tpu_custom_call.1
= control target key start
LH: loop header
LB: loop body
LE: loop exit
PB: predicated region body
PF: predicated region fallthrough
CT: control target
= control target key end

     0   :  { %s2205_s0 = inlined_call_operand.<no memory space> [shape: f32[1], index: 0, kind: input, shape index: {}]   ;;  %s2206_s1 = inlined_call_operand.hbm [shape: s32[16], index: 1, kind: input, shape index: {}]   ;;  %s2207_s2 = inlined_call_operand.hbm [shape: f32[32,128], index: 2, kind: input, shape index: {}]   ;;  %s2208_s3 = inlined_call_operand.vmem [shape: bf16[32,128], index: 3, kind: input, shape index: {}]   ;;  %s2209_s4 = inlined_call_operand.hbm [shape: bf16[64,128], index: 4, kind: input, shape index: {}]   ;;  %s2210_s5 = inlined_call_operand.vmem [shape: s32[64,2], index: 5, kind: input, shape index: {}]   ;;  %s2211_s6 = inlined_call_operand.vmem [shape: bf16[128,128], index: 6, kind: input, shape index: {}]   ;;  %s2212_s7 = inlined_call_operand.hbm [shape: bf16[128,128], index: 7, kind: input, shape index: {}]   ;;  %s2213_s8 = inlined_call_operand.hbm [shape: bf16[128,128], index: 8, kind: input, shape index: {}]   ;;  %s2214_s9 = inlined_call_operand.vmem [shape: f32[8,128], index: 9, kind: input, shape index: {}]   ;;  %s2215_s10 = inlined_call_operand.hbm [shape: f32[32,128], index: 10, kind: output, shape index: {}]  }
   0x1   :  { %2224 = sst [smem:[#allocation21_spill]] %s2215_s10 }
   0x2   :  { %15 = sst [smem:[#allocation3]] %s2205_s0 }
   0x3   :  { %16 = vsyncpa [#allocation7], 0 }
   0x4   :  { %17 = vsyncpa [#allocation5], 0 }
   0x5   :  { %18 = vsyncpa [#allocation10], 0 }
   0x6   :  { %20 = vsyncpa [#allocation10 + $0x1], 0 }
   0x7   :  { %21 = vsyncpa [#allocation13], 0 }
   0x8   :  { %22 = vsyncpa [#allocation6], 0  ;;  %s1851_s15 = smov 0   ;;  %s1853_s16 = smov 0  }
   0x9   :  { %s1855_s17 = smov 0   ;;  %s1857_s18 = smov 0  }
   0xa LB: > { %s1870_s0 = sadd.s32 4294967295, %s1762_s18   ;;  %p132_p0 = scmp.ne.s32.totalorder %s1754_s16, %s1750_s15  ;;  %s1762_s18 = sphi %s1857_s18, %s2247_s18   ;;  %s1758_s17 = sphi %s1855_s17, %s2246_s17   ;;  %s1754_s16 = sphi %s1853_s16, %s2245_s16   ;;  %s1750_s15 = sphi %s1851_s15, %s2244_s15  }
   0xb   : > { %p2216_p1 = scmp.eq.s32.totalorder %s1870_s0, 0  ;;  %p1233_p2 = scmp.ge.s32.totalorder %s1762_s18, 1 }
   0xc   : > { %p274_p3 = scmp.lt.s32.totalorder %s1762_s18, 5  ;;  %s1772_s21 = smov [#allocation11]  }
   0xd   : > { %p1879_p5 = por %p2216_p1, %p132_p0  ;;  %s317_s22 = sshll.u32 %s1772_s21, 4  ;;  %s318_s22 = int_to_ptr.vmem [resolvable:$true] %s317_s22 }
   0xe   : > { %p1883_p6 = pnand %p1233_p2, %p274_p3  ;;  %s1773_s24 = smov [#allocation8]  }
   0xf   : > { %s2225_s19 = scalar_select %p1879_p5, 1, 0 }
  0x10   : > { %s2226_s20 = scalar_select %p1883_p6, 1, 0 }
  0x11   : > { %p1420_p7 = pneg %p1883_p6  ;;  %s298_s25 = sshll.u32 %s1773_s24, 4  ;;  %s1895_s25 = int_to_ptr.vmem [resolvable:$true] %s298_s25 }
  0x12   : > { %s1547_s28 = scalar_lea.hbm %s2212_s7, 1024 }
  0x13   : > { %p1891_p8 = pnand %p1420_p7, %p2216_p1  ;;  %p1548_p9 = scmp.ne.s32.totalorder %s2212_s7, %s1547_s28 }
  0x14   : > { %p1554_p13 = scmp.lt.u32.totalorder %s1547_s28, %s2212_s7 }
  0x15   : > { %p1905_p10 = pneg %p1891_p8 }
  0x17   : > { %p1550_p11 = pnand %p1905_p10, %p1548_p9 }
  0x19   : > { %p1551_p12 = pneg %p1550_p11 }
  0x1b   : > { %p1556_p0 = pnand %p1554_p13, %p1551_p12 }
  0x1d   : > { %1559 = shalt.err (!%p1556_p0)
}
  0x1e   : > { %s1560_s14 = scalar_lea.vmem %s318_s22, 1024  ;;  %p1568_p4 = scmp.lt.s32.totalorder %s318_s22, %s318_s22 }
  0x1f   : > { %p1561_p2 = scmp.ne.s32.totalorder %s318_s22, %s1560_s14  ;;  %p1569_p1 = scmp.lt.s32.totalorder %s1560_s14, %s1560_s14 }
  0x21   : > { %p1563_p3 = pnand %p1561_p2, %p1905_p10  ;;  %p1570_p5 = por %p1569_p1, %p1568_p4 }
  0x23   : > { %p1564_p7 = pneg %p1563_p3 }
  0x25   : > { %p1571_p6 = pnand %p1570_p5, %p1564_p7 }
  0x27   : > { %1574 = shalt.err (!%p1571_p6)
}
  0x28   : > { %s2220_s15 = smov 64   ;;  %s2222_s21 = smov 4  }
  0x29   : > { %1429 = dma.hbm_to_vmem [thread:$0]  (!%p1891_p8), %s2212_s7, 1024, %s318_s22, [#allocation10], %s2220_s15, %s2220_s15, %s2222_s21  }
  0x2a   : > { %s1575_s29 = scalar_lea.hbm %s2206_s1, 16 }
  0x2b   : > { %p1576_p1 = scmp.ne.s32.totalorder %s2206_s1, %s1575_s29  ;;  %p1582_p6 = scmp.lt.u32.totalorder %s1575_s29, %s2206_s1 }
  0x2d   : > { %p1578_p4 = pnand %p1576_p1, %p1905_p10 }
  0x2f   : > { %p1579_p5 = pneg %p1578_p4 }
  0x31   : > { %p1584_p9 = pnand %p1582_p6, %p1579_p5 }
  0x33   : > { %1587 = shalt.err (!%p1584_p9)
}
  0x34   : > { %s1776_s10 = smov [#allocation4]   ;;  %s1588_s28 = scalar_lea.hbm %s2207_s2, 512 }
  0x35   : > { %1423 = dma.hbm_to_smem (!%p1891_p8), %s2206_s1, 16, %s1776_s10, [#allocation7]  }
  0x36   : > { %p1589_p11 = scmp.ne.s32.totalorder %s2207_s2, %s1588_s28  ;;  %p1595_p0 = scmp.lt.u32.totalorder %s1588_s28, %s2207_s2 }
  0x38   : > { %p1591_p12 = pnand %p1589_p11, %p1905_p10 }
  0x3a   : > { %p1592_p13 = pneg %p1591_p12 }
  0x3c   : > { %p1597_p2 = pnand %p1595_p0, %p1592_p13 }
  0x3e   : > { %1600 = shalt.err (!%p1597_p2)
}
  0x3f   : > { %s1601_s10 = scalar_lea.vmem %s1895_s25, 512  ;;  %p1609_p4 = scmp.lt.s32.totalorder %s1895_s25, %s1895_s25 }
  0x40   : > { %p1602_p3 = scmp.ne.s32.totalorder %s1895_s25, %s1601_s10  ;;  %p1610_p5 = scmp.lt.s32.totalorder %s1601_s10, %s1601_s10 }
  0x42   : > { %p1604_p7 = pnand %p1602_p3, %p1905_p10  ;;  %p1611_p6 = por %p1610_p5, %p1609_p4 }
  0x44   : > { %p1605_p1 = pneg %p1604_p7 }
  0x46   : > { %p1612_p9 = pnand %p1611_p6, %p1605_p1 }
  0x48   : > { %1615 = shalt.err (!%p1612_p9)
}
  0x49   : > { %s1777_s14 = smov 128   ;;  %s1778_s22 = smov 8  }
  0x4a   : > { %1426 = dma.hbm_to_vmem [thread:$0]  (!%p1891_p8), %s2207_s2, 512, %s1895_s25, [#allocation5], %s1777_s14, %s1777_s14, %s1778_s22  }
  0x4b   : > { %s1779_s27 = smov [#allocation12]   ;;  %s1616_s29 = scalar_lea.hbm %s2213_s8, 1024 }
  0x4c   : > { %s330_s28 = sshll.u32 %s1779_s27, 4  ;;  %p1617_p11 = scmp.ne.s32.totalorder %s2213_s8, %s1616_s29  ;;  %s331_s28 = int_to_ptr.vmem [resolvable:$true] %s330_s28 }
  0x4d   : > { %p1623_p0 = scmp.lt.u32.totalorder %s1616_s29, %s2213_s8 }
  0x4e   : > { %p1619_p12 = pnand %p1617_p11, %p1905_p10 }
  0x50   : > { %p1620_p13 = pneg %p1619_p12 }
  0x52   : > { %p1625_p2 = pnand %p1623_p0, %p1620_p13 }
  0x54   : > { %1628 = shalt.err (!%p1625_p2)
}
  0x55   : > { %s1629_s25 = scalar_lea.vmem %s331_s28, 1024  ;;  %p1637_p4 = scmp.lt.s32.totalorder %s331_s28, %s331_s28 }
  0x56   : > { %p1630_p3 = scmp.ne.s32.totalorder %s331_s28, %s1629_s25  ;;  %p1638_p5 = scmp.lt.s32.totalorder %s1629_s25, %s1629_s25 }
  0x58   : > { %p1632_p7 = pnand %p1630_p3, %p1905_p10  ;;  %p1639_p6 = por %p1638_p5, %p1637_p4 }
  0x5a   : > { %p1633_p1 = pneg %p1632_p7 }
  0x5c   : > { %p1640_p9 = pnand %p1639_p6, %p1633_p1 }
  0x5e   : > { %1643 = shalt.err (!%p1640_p9)
}
  0x5f   : > { %s2229_s14 = smov 4   ;;  %s2230_s22 = smov 64  }
  0x60   : > { %1432 = dma.hbm_to_vmem [thread:$0]  (!%p1891_p8), %s2213_s8, 1024, %s331_s28, [#allocation13], %s2230_s22, %s2230_s22, %s2229_s14  }
  0x61   : > { %s1985_s11 = sadd.s32 1, %s1762_s18   ;;  %s119_s23 = sadd.s32 1, %s1758_s17 }
  0x62   : > { %s116_s24 = ssub.s32 %s1762_s18, %s1985_s11  ;;  %p126_p10 = scmp.ne.s32.totalorder %s1758_s17, %s1754_s16 }
  0x63   : > { %p117_p11 = scmp.eq.s32.totalorder %s116_s24, 0  ;;  %p127_p12 = scmp.eq.s32.totalorder %s1762_s18, 0 }
  0x64   : > { %p1441_p13 = scmp.lt.s32.totalorder %s1762_s18, 4  ;;  %s347_s26 = sand.u32 1, %s1762_s18  }
  0x65   : > { %s1996_s27 = scalar_select %p117_p11, %s1758_s17, %s119_s23  }
  0x66   : > { %p128_p0 = por %p127_p12, %p126_p10  ;;  %s349_s30 = sand.u32 1, %s1758_s17  }
  0x67   : > { %s1292_s12 = sshll.u32 %s1762_s18, 7  ;;  %s1239_s29 = sshll.u32 %s349_s30, 3 }
  0x68   : > { %s2003_s28 = scalar_lea.hbm %s2209_s4, %s1292_s12  ;;  %p2005_p8 = pnand %p1441_p13, %p128_p0 }
  0x69   : > { %s351_s15 = scalar_lea.vmem [#allocation9], %s1239_s29  ;;  %s2011_s18 = scalar_lea.sflag [#allocation10], %s347_s26 }
  0x6a   : > { %s358_s21 = sshll.u32 %s351_s15, 4  ;;  %s1644_s23 = scalar_lea.hbm %s2003_s28, 128  ;;  %s2009_s21 = int_to_ptr.vmem [resolvable:$true] %s358_s21 }
  0x6b   : > { %p1645_p2 = scmp.ne.s32.totalorder %s2003_s28, %s1644_s23  ;;  %p1646_p3 = pneg %p2005_p8 }
  0x6c   : > { %s1649_s12 = scalar_lea.hbm %s2209_s4, 512  ;;  %p1650_p4 = scmp.lt.u32.totalorder %s2003_s28, %s2209_s4 }
  0x6d   : > { %p1647_p7 = pnand %p1646_p3, %p1645_p2  ;;  %p1651_p5 = scmp.lt.u32.totalorder %s1649_s12, %s1644_s23 }
  0x6e   : > { %p1653_p9 = scmp.lt.u32.totalorder %s1644_s23, %s2003_s28 }
  0x6f   : > { %p1648_p1 = pneg %p1647_p7  ;;  %p1652_p6 = por %p1651_p5, %p1650_p4 }
  0x71   : > { %p1654_p10 = por %p1653_p9, %p1652_p6 }
  0x73   : > { %p1655_p11 = pnand %p1654_p10, %p1648_p1 }
  0x75   : > { %1658 = shalt.err (!%p1655_p11)
}
  0x76   : > { %s1659_s26 = scalar_lea.vmem %s2009_s21, 128  ;;  %s1780_s29 = smov [#allocation9]  }
  0x77   : > { %p1660_p12 = scmp.ne.s32.totalorder %s2009_s21, %s1659_s26  ;;  %s1664_s15 = sshll.u32 %s1780_s29, 4  ;;  %s1665_s15 = int_to_ptr.vmem [resolvable:$false] %s1664_s15 }
  0x78   : > { %s1666_s24 = scalar_lea.vmem %s1665_s15, 256  ;;  %p1667_p2 = scmp.lt.s32.totalorder %s2009_s21, %s1665_s15 }
  0x79   : > { %p1662_p13 = pnand %p1660_p12, %p1646_p3  ;;  %p1668_p7 = scmp.lt.s32.totalorder %s1666_s24, %s1659_s26 }
  0x7b   : > { %p1663_p0 = pneg %p1662_p13  ;;  %p1669_p4 = por %p1668_p7, %p1667_p2 }
  0x7d   : > { %p1670_p5 = pnand %p1669_p4, %p1663_p0 }
  0x7f   : > { %1673 = shalt.err (!%p1670_p5)
}
  0x80   : > { %1436 = dma.hbm_to_vmem [thread:$0]  (!%p2005_p8), %s2003_s28, 128, %s2009_s21, %s2011_s18, %s2230_s22, %s2230_s22, %s2229_s14  }
  0x81   : > { %p2232_p3 = scmp.ne.s32.totalorder %s2226_s20, 0 }
  0x82   : > { %p2233_p1 = scmp.eq.s32.totalorder (!%p2232_p3), %s1870_s0, 0 }
  0x83   : > { %379 = sbr.rel (%p2232_p3) target bundleno = 1786 (0x6fa), region = 60 }
  0x8a   : > { %1725 = dma.done.wait (%p2233_p1), [#allocation7], 16   ;;  %p2234_p6 = pmov %p2233_p1 }
  0x8b   : > { %p2235_p9 = pmov %p2233_p1 }
  0x8c   : > { %1727 = vsyncadd (%p2234_p6), [#allocation7], 4294967280 }
  0x8d   : > { %1729 = dma.done.wait (%p2235_p9), [#allocation5], 512   ;;  %p2236_p10 = pmov %p2233_p1 }
  0x8e   : > { %s389_s25 = sand.u32 1, %s1870_s0   ;;  %s391_s14 = sand.u32 1, %s1754_s16  }
  0x8f   : > { %1731 = vsyncadd (%p2236_p10), [#allocation5], 4294966784  ;;  %s2054_s22 = sshll.u32 %s391_s14, 3  ;;  %s390_s20 = scalar_lea.sflag [#allocation10], %s389_s25 }
  0x90   : > { %s393_s28 = scalar_lea.vmem [#allocation9], %s2054_s22  ;;  %p2237_p8 = scmp.ne.s32.totalorder %s2225_s19, 0 }
  0x92   : > { %1733 = dma.done.wait (%p2237_p8), %s390_s20, 128  }
  0x93   : > { %1735 = vsyncadd (%p2237_p8), %s390_s20, 4294967168  ;;  %p2238_p11 = pmov %p2233_p1 }
  0x94   : > { %p2239_p12 = pmov %p2233_p1 }
  0x95   : > { %1737 = dma.done.wait (%p2238_p11), [#allocation10], 1024  }
  0x96   : > { %1739 = vsyncadd (%p2239_p12), [#allocation10], 4294966272  ;;  %p2240_p13 = pmov %p2233_p1 }
  0x97   : > { %p2241_p0 = pmov %p2233_p1 }
  0x98   : > { %1741 = dma.done.wait (%p2240_p13), [#allocation13], 1024  }
  0x99   : > { %1743 = vsyncadd (%p2241_p0), [#allocation13], 4294966272 }
  0x9a   : > { %406 = sfence }
  0x9b   : > { %s1248_s21 = sshll.u32 %s1870_s0, 1  ;;  %p2242_p7 = scmp.ne.s32.totalorder %s1870_s0, 0 }
  0x9c   : > { %p441_p2 = scmp.lt.s32.totalorder %s1248_s21, 7  ;;  %v1781_v0 = vmov (!%p2242_p7), 0.0  }
  0x9d   : > { %450 = sbr.rel (%p2242_p7) target bundleno = 164 (0xa4), region = 84  ;;  %451 = vst [vmem:[#allocation14] sm:$0xff] (!%p2242_p7), %v1781_v0  ;;  %452 = vst [vmem:[#allocation14 + $0x8] sm:$0xff] (!%p2242_p7), %v1781_v0 }
  0x9e   : > { %s2249_s21 = smov (!%p441_p2, %s1248_s21), 7  ;;  %453 = vst [vmem:[#allocation14 + $0x10] sm:$0xff] (!%p2242_p7), %v1781_v0  ;;  %454 = vst [vmem:[#allocation14 + $0x18] sm:$0xff] (!%p2242_p7), %v1781_v0 }
  0x9f   : > { %s1249_s18 = sshll.u32 %s2249_s21, 3 }
  0xa0   : > { %s444_s30 = scalar_lea.vmem %s2210_s5, %s1249_s18 }
  0xa4 PF: > { %v2075_v1 = vld [vmem:[%s444_s30] sm:$0xff]  ;;  %v2077_v2 = vld [vmem:[%s444_s30 + $0x8] sm:$0xff]  ;;  %s1251_s12 = sshll.u32 %s1870_s0, 2  ;;  %v1782_v3 = vmov 0.0   ;;  %vm1783_vm0 = vmmov 0   ;;  %v1519_v6 = vld [vmem:[%s2211_s6 + $0x10] sm:$0xff]   ;;  %v484_v13 = vlaneseq }
  0xa5   : > { %s2080_s13 = sld [smem:[#allocation4 + %s1251_s12]]   ;;  %s459_s10 = sadd.s32 1, %s1251_s12  ;;  %1326 = vmatprep.subr.bf16.mxu0 %v1782_v3  ;;  %583 = vst [vmem:[#allocation2] sm:$0xff] %v1782_v3  ;;  %584 = vst [vmem:[#allocation2 + $0x8] sm:$0xff] %v1782_v3  ;;  %v1517_v4 = vld [vmem:[%s2211_s6] sm:$0xff]   ;;  %v1518_v5 = vld [vmem:[%s2211_s6 + $0x8] sm:$0xff]   ;;  %1342 = vmatprep.mubr.msk.bf16.mxu0 %vm1783_vm0, %v1782_v3 }
  0xa6   : > { %s2088_s25 = sld [smem:[#allocation4 + %s459_s10]]  ;;  %s461_s14 = sadd.s32 2, %s1251_s12  ;;  %1327 = vmatpush3.bf16.msra.mxu0 %v1517_v4  ;;  %v1520_v7 = vld [vmem:[%s2211_s6 + $0x18] sm:$0xff]   ;;  %v1521_v8 = vld [vmem:[%s2211_s6 + $0x20] sm:$0xff]   ;;  %v1522_v9 = vld [vmem:[%s2211_s6 + $0x28] sm:$0xff]   ;;  %v2115_v14 = vshrl.u32 %v484_v13, 7 }
  0xa7   : > { %s2090_s20 = sld [smem:[#allocation4 + %s461_s14]]   ;;  %s463_s21 = sadd.s32 3, %s1251_s12  ;;  %1328 = vmatprep.subr.bf16.mxu0 %v1782_v3  ;;  %v1523_v10 = vld [vmem:[%s2211_s6 + $0x30] sm:$0xff]   ;;  %v1524_v11 = vld [vmem:[%s2211_s6 + $0x38] sm:$0xff]   ;;  %v2121_v16 = vld [vmem:[%s2214_s9] sm:$0xff] }
  0xa8   : > { %s2092_s18 = sld [smem:[#allocation4 + %s463_s21]]  ;;  %v1525_v12 = vld [vmem:[%s393_s28] sm:$0xff]   ;;  %v486_v15 = vsub.s32 0, %v2115_v14 }
  0xaa   : > { %1329 = vmatpush3.bf16.msra.mxu0 %v1518_v5  ;;  %v487_v17 = vrot.slane %v2121_v16, %v486_v15 }
  0xab   : > { %1330 = vmatprep.subr.bf16.mxu0 %v1782_v3 }
  0xac   : > { %p1161_p4 = scmp.ge.s32.totalorder %s2080_s13, %s2088_s25 }
  0xae   : > { %1331 = vmatpush3.bf16.msra.mxu0 %v1519_v6 }
  0xaf   : > { %1332 = vmatprep.subr.bf16.mxu0 %v1782_v3 }
  0xb2   : > { %1333 = vmatpush3.bf16.msra.mxu0 %v1520_v7 }
  0xb3   : > { %1334 = vmatprep.subr.bf16.mxu0 %v1782_v3 }
  0xb6   : > { %1335 = vmatpush3.bf16.msra.mxu0 %v1521_v8 }
  0xb7   : > { %1336 = vmatprep.subr.bf16.mxu0 %v1782_v3 }
  0xba   : > { %1337 = vmatpush3.bf16.msra.mxu0 %v1522_v9 }
  0xbb   : > { %1338 = vmatprep.subr.bf16.mxu0 %v1782_v3 }
  0xbe   : > { %1339 = vmatpush3.bf16.msra.mxu0 %v1523_v10 }
  0xbf   : > { %1340 = vmatprep.subr.bf16.mxu0 %v1782_v3 }
  0xc2   : > { %1341 = vmatpush3.bf16.msra.mxu0 %v1524_v11 }
  0xc5   : > { %1343 = vmatmul.mubr.bf16.vlgmr.msra.gmra.mrb[0].mxu0 %v1525_v12 }
 0x195   : > { %1162 = sbr.rel (%p1161_p4) target bundleno = 767 (0x2ff), region = 136 }
 0x198   : > { %v576_v18 = vpop.f32.mrb[0].mxu0 }
 0x199   : > { %v577_v19 = vadd.f32 %v576_v18, %v487_v17  ;;  %v1344_v20 = vpop.f32.mrb[1].mxu0 }
 0x19a   : > { %v579_v21 = vpop.f32.mrb[2].mxu0 }
 0x19b   : > { %v580_v22 = vadd.f32 %v579_v21, %v487_v17  ;;  %v1345_v23 = vpop.f32.mrb[3].mxu0 }
 0x19c LB: >> { %v1784_v24 = vmov 0   ;;  %v1785_v25 = vmov 0.0   ;;  %s1261_s22 = sshll.u32 %s1766_s13, 4  ;;  %vm1786_vm1 = vmmov 0   ;;  %v593_v27 = vand.u32 127, %v484_v13  ;;  %v615_v35 = vld [vmem:[#allocation2] sm:$0xff]  ;;  %s1766_s13 = sphi %s2080_s13, %s588_s13  }
 0x19d   : >> { %1526 = vset.pattern.permute.xlu0 %v1784_v24  ;;  %1346 = vmatprep.subr.bf16.mxu0 %v1785_v25  ;;  %s609_s28 = sshra.s32 %s1261_s22, 3  ;;  %v594_v28 = vstv %s1261_s22  ;;  %vm623_vm4 = vcmask 130048   ;;  %v616_v37 = vld [vmem:[#allocation2 + $0x8] sm:$0xff]  ;;  %s588_s13 = sadd.s32 1, %s1766_s13  }
 0x19e   : >> { %597 = vperm.xlu0 %1526, %v2075_v1   ;;  %s1264_s10 = sshll.u32 %s609_s28, 2  ;;  %1348 = vmatprep.mubr.msk.bf16.mxu0 %vm1786_vm1, %v1785_v25  ;;  %v595_v29 = vadd.s32 %v594_v28, %v593_v27  ;;  %p587_p5 = scmp.ge.s32.totalorder %s588_s13, %s2088_s25 }
 0x19f   : >> { %s612_s29 = scalar_lea.vmem %s2208_s3, %s1264_s10 }
 0x1a0   : >> { %v1527_v26 = vld [vmem:[%s612_s29] sm:$0xff]  }
 0x1a1   : >> { %1347 = vmatpush3.bf16.msra.mxu0 %v1527_v26 }
 0x1a2   : >> { %600 = vperm.xlu0 %1526, %v2077_v2  }
 0x21d   : >> { %v598_v30 = vpop.permute.xlu0 %597 }
 0x21e   : >> { %vm602_vm2 = vcmp.eq.s32.totalorder %v595_v29, %v598_v30 }
 0x21f   : >> { %v1262_v32 = vsel %vm602_vm2, 1.0, %v1785_v25 }
 0x221   : >> { %v601_v31 = vpop.permute.xlu0 %600 }
 0x222   : >> { %vm603_vm3 = vcmp.eq.s32.totalorder %v595_v29, %v601_v31 }
 0x223   : >> { %v1263_v33 = vsel %vm603_vm3, 1.0, %v1785_v25 }
 0x224   : >> { %v608_v34 = vpack.c.bf16 %v1263_v33, %v1262_v32 }
 0x226   : >> { %1349 = vmatmul.mubr.msk.bf16.vlgmr.msra.gmra.mrb[0].mxu0 %vm623_vm4, %v608_v34 }
 0x2f8   : > { %590 = sbr.rel (!%p587_p5) target bundleno = 412 (0x19c), region = 142 }
 0x2f9   : >> { %v661_v36 = vpop.f32.mrb[0].mxu0 }
 0x2fa   : >> { %v668_v38 = vadd.f32 %v661_v36, %v615_v35  ;;  %v1350_v39 = vpop.f32.mrb[1].mxu0 }
 0x2fb   : >> { %v664_v40 = vpop.f32.mrb[2].mxu0 }
 0x2fc   : >> { %670 = vst [vmem:[#allocation2] sm:$0xff] %v668_v38  ;;  %v669_v41 = vadd.f32 %v664_v40, %v616_v37  ;;  %v1351_v42 = vpop.f32.mrb[3].mxu0 }
 0x2fe   : >> { %671 = vst [vmem:[#allocation2 + $0x8] sm:$0xff] %v669_v41 }
 0x2ff PF: > { %p1166_p3 = scmp.ge.s32.totalorder %s2090_s20, %s2092_s18 }
 0x303   : > { %v672_v43 = vld [vmem:[#allocation2] sm:$0xff] }
 0x304   : > { %v674_v45 = vadd.f32 %v672_v43, %v577_v19  ;;  %1167 = sbr.rel (%p1166_p3) target bundleno = 1237 (0x4d5), region = 147 }
 0x305   : > { %v673_v44 = vld [vmem:[#allocation2 + $0x8] sm:$0xff] }
 0x306   : > { %v675_v46 = vadd.f32 %v673_v44, %v580_v22  ;;  %v676_v47 = vmax.f32 %v674_v45, 0.0 }
 0x308   : > { %v677_v48 = vmax.f32 %v675_v46, 0.0 }
 0x30a   : > { %v678_v49 = vpack.c.bf16 %v677_v48, %v676_v47 }
 0x30b LB: >> { %v1787_v50 = vmov 1   ;;  %v1788_v51 = vmov 0.0   ;;  %vm1789_vm5 = vmmov 0   ;;  %s1267_s13 = sshll.u32 %s1770_s20, 4  ;;  %v687_v52 = vand.u32 127, %v484_v13  ;;  %s682_s20 = sadd.s32 1, %s1770_s20   ;;  %s1770_s20 = sphi %s2090_s20, %s682_s20  }
 0x30c   : >> { %1528 = vset.pattern.permute.xlu0 %v1787_v50  ;;  %1352 = vmatprep.subr.bf16.mxu0 %v1788_v51  ;;  %v688_v53 = vstv %s1267_s13  ;;  %vm719_vm8 = vcmask 130048   ;;  %s764_s25 = scalar_lea.vmem [#allocation14], %s1267_s13  ;;  %p681_p1 = scmp.ge.s32.totalorder %s682_s20, %s2092_s18 }
 0x30d   : >> { %691 = vperm.xlu0 %1528, %v2075_v1   ;;  %1353 = vmatpush3.bf16.msra.mxu0 %v678_v49  ;;  %v689_v54 = vadd.s32 %v688_v53, %v687_v52  ;;  %v765_v61 = vld [vmem:[%s764_s25] sm:$0xff]  ;;  %v766_v63 = vld [vmem:[%s764_s25 + $0x8] sm:$0xff] }
 0x30e   : >> { %1354 = vmatprep.mubr.msk.bf16.mxu0 %vm1789_vm5, %v1788_v51 }
 0x311   : >> { %694 = vperm.xlu0 %1528, %v2077_v2  }
 0x38c   : >> { %v692_v55 = vpop.permute.xlu0 %691 }
 0x38d   : >> { %vm696_vm6 = vcmp.eq.s32.totalorder %v689_v54, %v692_v55 }
 0x38e   : >> { %v1268_v57 = vsel %vm696_vm6, 1.0, %v1788_v51 }
 0x390   : >> { %v695_v56 = vpop.permute.xlu0 %694 }
 0x391   : >> { %vm697_vm7 = vcmp.eq.s32.totalorder %v689_v54, %v695_v56 }
 0x392   : >> { %v1269_v58 = vsel %vm697_vm7, 1.0, %v1788_v51 }
 0x393   : >> { %v702_v59 = vpack.c.bf16 %v1269_v58, %v1268_v57 }
 0x395   : >> { %703 = vxpose.xlu1.c.b16.start.end [1/1] (short) (narrow) %v702_v59, 16 }
 0x3fb   : >> { %v711_v60 = vpop.trf.xlu1 }
 0x3fc   : >> { %1355 = vmatmul.mubr.msk.bf16.vlgmr.msra.gmra.mrb[0].mxu0 %vm719_vm8, %v711_v60 }
 0x4ce   : > { %684 = sbr.rel (!%p681_p1) target bundleno = 779 (0x30b), region = 153 }
 0x4cf   : >> { %v757_v62 = vpop.f32.mrb[0].mxu0 }
 0x4d0   : >> { %v767_v0 = vadd.f32 %v765_v61, %v757_v62  ;;  %v1356_v3 = vpop.f32.mrb[1].mxu0 }
 0x4d1   : >> { %v760_v4 = vpop.f32.mrb[2].mxu0 }
 0x4d2   : >> { %769 = vst [vmem:[%s764_s25] sm:$0xff] %v767_v0  ;;  %v768_v5 = vadd.f32 %v766_v63, %v760_v4  ;;  %v1357_v6 = vpop.f32.mrb[3].mxu0 }
 0x4d4   : >> { %770 = vst [vmem:[%s764_s25 + $0x8] sm:$0xff] %v768_v5 }
 0x4d5 PF: > { %p1271_p6 = scmp.ne.s32.totalorder %s1870_s0, 3 }
 0x4d6   : > { %v1529_v7 = vld [vmem:[#allocation11] sm:$0xff] (!%p1271_p6)   ;;  %v1530_v8 = vld [vmem:[#allocation11 + $0x8] sm:$0xff] (!%p1271_p6)   ;;  %v1531_v9 = vld [vmem:[#allocation11 + $0x10] sm:$0xff] (!%p1271_p6)   ;;  %s775_s15 = sld [smem:[#allocation3]] (!%p1271_p6)  ;;  %v813_v42 = vsub.s32 (!%p1271_p6), 1, %v2115_v14  ;;  %v916_v45 = vadd.s32 (!%p1271_p6), 24, %v2115_v14 }
 0x4d7   : > { %774 = sbr.rel (%p1271_p6) target bundleno = 1754 (0x6da), region = 102  ;;  %1358 = vmatprep.subr.bf16.mxu0 (!%p1271_p6), %v1529_v7  ;;  %v1532_v10 = vld [vmem:[#allocation11 + $0x18] sm:$0xff] (!%p1271_p6)   ;;  %v1533_v11 = vld [vmem:[#allocation11 + $0x20] sm:$0xff] (!%p1271_p6)   ;;  %v780_v12 = vld [vmem:[#allocation8] sm:$0xff] (!%p1271_p6) }
 0x4d8   : > { %1359 = vmatpush3.bf16.msra.mxu0 (!%p1271_p6), %v1529_v7  ;;  %v781_v15 = vld [vmem:[#allocation8 + $0x8] sm:$0xff] (!%p1271_p6)  ;;  %v1534_v19 = vld [vmem:[#allocation11 + $0x28] sm:$0xff] (!%p1271_p6)   ;;  %v782_v23 = vld [vmem:[#allocation8 + $0x10] sm:$0xff] (!%p1271_p6)  ;;  %v814_v43 = vrot.slane (!%p1271_p6), %v2121_v16, %v813_v42  ;;  %vm920_vm9 = vcmp.lt.s32.totalorder (!%p1271_p6), %v916_v45, 30 }
 0x4d9   : > { %1360 = vmatprep.subr.bf16.mxu0 (!%p1271_p6), %v1530_v8  ;;  %v783_v24 = vld [vmem:[#allocation8 + $0x18] sm:$0xff] (!%p1271_p6)  ;;  %v1535_v25 = vld [vmem:[#allocation11 + $0x30] sm:$0xff] (!%p1271_p6)   ;;  %v1536_v30 = vld [vmem:[#allocation11 + $0x38] sm:$0xff] (!%p1271_p6)  }
 0x4da   : > { %v1537_v34 = vld [vmem:[#allocation12] sm:$0xff] (!%p1271_p6)   ;;  %v1538_v35 = vld [vmem:[#allocation12 + $0x8] sm:$0xff] (!%p1271_p6)   ;;  %v1539_v36 = vld [vmem:[#allocation12 + $0x10] sm:$0xff] (!%p1271_p6)  }
 0x4db   : > { %v776_v17 = vld [vmem:[#allocation14] sm:$0xff] (!%p1271_p6)  ;;  %v777_v1 = vld [vmem:[#allocation14 + $0x8] sm:$0xff] (!%p1271_p6)  ;;  %v778_v28 = vld [vmem:[#allocation14 + $0x10] sm:$0xff] (!%p1271_p6)  ;;  %1378 = vmatprep.subr.bf16.mxu1 (!%p1271_p6), %v1537_v34 }
 0x4dc   : > { %1361 = vmatpush3.bf16.msra.mxu0 (!%p1271_p6), %v1530_v8  ;;  %v784_v2 = vstv (!%p1271_p6), %s775_s15  ;;  %v779_v29 = vld [vmem:[#allocation14 + $0x18] sm:$0xff] (!%p1271_p6)  ;;  %1379 = vmatpush3.bf16.msra.mxu1 (!%p1271_p6), %v1537_v34  ;;  %v1541_v38 = vld [vmem:[#allocation12 + $0x20] sm:$0xff] (!%p1271_p6)   ;;  %v1542_v39 = vld [vmem:[#allocation12 + $0x28] sm:$0xff] (!%p1271_p6)  }
 0x4dd   : > { %1362 = vmatprep.subr.bf16.mxu0 (!%p1271_p6), %v1531_v9  ;;  %v785_v13 = vmul.f32 (!%p1271_p6), %v784_v2, %v780_v12  ;;  %v786_v18 = vmul.f32 (!%p1271_p6), %v784_v2, %v781_v15  ;;  %v787_v26 = vmul.f32 (!%p1271_p6), %v784_v2, %v782_v23  ;;  %v788_v27 = vmul.f32 (!%p1271_p6), %v784_v2, %v783_v24  ;;  %v1540_v37 = vld [vmem:[#allocation12 + $0x18] sm:$0xff] (!%p1271_p6)   ;;  %v1543_v40 = vld [vmem:[#allocation12 + $0x30] sm:$0xff] (!%p1271_p6)  }
 0x4de   : > { %1380 = vmatprep.subr.bf16.mxu1 %v1538_v35  ;;  %v1544_v41 = vld [vmem:[#allocation12 + $0x38] sm:$0xff]   ;;  %v963_v23 = vsub.s32 2, %v2115_v14  ;;  %v971_v24 = vsub.s32 3, %v2115_v14 }
 0x4df   : > { %v789_v20 = vadd.f32 %v785_v13, %v776_v17  ;;  %v790_v21 = vadd.f32 %v786_v18, %v777_v1  ;;  %v791_v31 = vadd.f32 %v787_v26, %v778_v28  ;;  %v792_v32 = vadd.f32 %v788_v27, %v779_v29 }
 0x4e0   : > { %1363 = vmatpush3.bf16.msra.mxu0 %v1531_v9  ;;  %1381 = vmatpush3.bf16.msra.mxu1 %v1538_v35  ;;  %v972_v27 = vrot.slane %v2121_v16, %v971_v24 }
 0x4e1   : > { %1364 = vmatprep.subr.bf16.mxu0 %v1532_v10  ;;  %v793_v22 = vpack.c.bf16 %v790_v21, %v789_v20  ;;  %v794_v33 = vpack.c.bf16 %v792_v32, %v791_v31  ;;  %1382 = vmatprep.subr.bf16.mxu1 %v1539_v36 }
 0x4e3   : > { %1374 = vmatprep.mubr.bf16.mxu0 %v793_v22 }
 0x4e4   : > { %1365 = vmatpush3.bf16.msra.mxu0 %v1532_v10  ;;  %1383 = vmatpush3.bf16.msra.mxu1 %v1539_v36 }
 0x4e5   : > { %1366 = vmatprep.subr.bf16.mxu0 %v1533_v11  ;;  %1384 = vmatprep.subr.bf16.mxu1 %v1540_v37 }
 0x4e8   : > { %1367 = vmatpush3.bf16.msra.mxu0 %v1533_v11  ;;  %1385 = vmatpush3.bf16.msra.mxu1 %v1540_v37 }
 0x4e9   : > { %1368 = vmatprep.subr.bf16.mxu0 %v1534_v19  ;;  %1386 = vmatprep.subr.bf16.mxu1 %v1541_v38 }
 0x4ec   : > { %1369 = vmatpush3.bf16.msra.mxu0 %v1534_v19  ;;  %1387 = vmatpush3.bf16.msra.mxu1 %v1541_v38 }
 0x4ed   : > { %1370 = vmatprep.subr.bf16.mxu0 %v1535_v25  ;;  %1388 = vmatprep.subr.bf16.mxu1 %v1542_v39 }
 0x4f0   : > { %1371 = vmatpush3.bf16.msra.mxu0 %v1535_v25  ;;  %1389 = vmatpush3.bf16.msra.mxu1 %v1542_v39  ;;  %v964_v25 = vrot.slane %v2121_v16, %v963_v23 }
 0x4f1   : > { %1372 = vmatprep.subr.bf16.mxu0 %v1536_v30  ;;  %1390 = vmatprep.subr.bf16.mxu1 %v1543_v40 }
 0x4f4   : > { %1373 = vmatpush3.bf16.msra.mxu0 %v1536_v30  ;;  %1391 = vmatpush3.bf16.msra.mxu1 %v1543_v40 }
 0x4f5   : > { %1392 = vmatprep.subr.bf16.mxu1 %v1544_v41 }
 0x4f7   : > { %1375 = vmatmul.mubr.bf16.vlgmr.msra.gmra.mrb[0].mxu0 %v794_v33 }
 0x4f8   : > { %1393 = vmatpush3.bf16.msra.mxu1 %v1544_v41 }
 0x5ca   : > { %v1376_v44 = vpop.f32.mrb[0].mxu0 }
 0x5cb   : > { %v897_v46 = vpop.f32.mrb[1].mxu0  ;;  %v906_v51 = vadd.f32 %v1376_v44, %v814_v43 }
 0x5cc   : > { %v898_v47 = vadd.f32 %v897_v46, %v814_v43  ;;  %v1377_v48 = vpop.f32.mrb[2].mxu0  ;;  %v1001_v46 = vsub.s32 4, %v2115_v14 }
 0x5cd   : > { %v909_v49 = vadd.f32 %v1377_v48, %v814_v43  ;;  %v900_v50 = vpop.f32.mrb[3].mxu0  ;;  %v937_v57 = vmul.f32 %v906_v51, %v906_v51 }
 0x5ce   : > { %v901_v52 = vadd.f32 %v900_v50, %v814_v43  ;;  %v935_v53 = vmul.f32 %v898_v47, %v898_v47 }
 0x5cf   : > { %v924_v56 = vsel %vm920_vm9, %v909_v49, 0.0 }
 0x5d0   : > { %v925_v54 = vadd.f32 %v901_v52, %v898_v47  ;;  %v936_v55 = vmul.f32 %v901_v52, %v901_v52  ;;  %v938_v60 = vmul.f32 %v924_v56, %v924_v56 }
 0x5d2   : > { %v926_v58 = vadd.f32 %v925_v54, %v906_v51  ;;  %v939_v59 = vadd.f32 %v936_v55, %v935_v53 }
 0x5d4   : > { %v927_v61 = vadd.f32 %v926_v58, %v924_v56  ;;  %v940_v62 = vadd.f32 %v939_v59, %v937_v57 }
 0x5d6   : > { %v928_v63 = vrot.slane %v927_v61, 4  ;;  %v941_v0 = vadd.f32 %v940_v62, %v938_v60 }
 0x5d8   : > { %v929_v3 = vadd.f32 %v928_v63, %v927_v61  ;;  %v942_v4 = vrot.slane %v941_v0, 4 }
 0x5da   : > { %v930_v5 = vrot.slane %v929_v3, 2  ;;  %v943_v6 = vadd.f32 %v942_v4, %v941_v0 }
 0x5dc   : > { %v931_v7 = vadd.f32 %v930_v5, %v929_v3  ;;  %v944_v8 = vrot.slane %v943_v6, 2 }
 0x5de   : > { %v932_v9 = vrot.slane %v931_v7, 1  ;;  %v945_v10 = vadd.f32 %v944_v8, %v943_v6 }
 0x5e0   : > { %v933_v11 = vadd.f32 %v932_v9, %v931_v7  ;;  %v946_v12 = vrot.slane %v945_v10, 1 }
 0x5e2   : > { %v934_v15 = vmul.f32 0.033333335, %v933_v11  ;;  %v947_v17 = vadd.f32 %v946_v12, %v945_v10 }
 0x5e4   : > { %v948_v1 = vmul.f32 0.033333335, %v947_v17  ;;  %v949_v2 = vmul.f32 %v934_v15, %v934_v15  ;;  %v952_v13 = vsub.f32 %v901_v52, %v934_v15  ;;  %v951_v18 = vsub.f32 %v898_v47, %v934_v15 }
 0x5e5   : > { %v953_v19 = vsub.f32 %v906_v51, %v934_v15  ;;  %v954_v20 = vsub.f32 %v909_v49, %v934_v15  ;;  %v1002_v47 = vrot.slane %v2121_v16, %v1001_v46 }
 0x5e6   : > { %v950_v21 = vsub.f32 %v948_v1, %v949_v2 }
 0x5e8   : > { %v955_v22 = vadd.f32 1e-05, %v950_v21 }
 0x5ea   : > { %1545 = vrsqrt.f32 %v955_v22 }
 0x5f4   : > { %v1546_v26 = vpop.eup %1545 }
 0x5f5   : > { %v957_v28 = vmul.f32 %v1546_v26, %v951_v18  ;;  %v958_v29 = vmul.f32 %v1546_v26, %v952_v13  ;;  %v959_v30 = vmul.f32 %v1546_v26, %v953_v19  ;;  %v960_v31 = vmul.f32 %v1546_v26, %v954_v20 }
 0x5f7   : > { %v965_v32 = vmul.f32 %v964_v25, %v957_v28  ;;  %v966_v33 = vmul.f32 %v964_v25, %v958_v29  ;;  %v967_v34 = vmul.f32 %v964_v25, %v959_v30  ;;  %v968_v35 = vmul.f32 %v964_v25, %v960_v31 }
 0x5f9   : > { %v973_v36 = vadd.f32 %v972_v27, %v965_v32  ;;  %v974_v37 = vadd.f32 %v972_v27, %v966_v33  ;;  %v975_v38 = vadd.f32 %v972_v27, %v967_v34  ;;  %v976_v39 = vadd.f32 %v972_v27, %v968_v35 }
 0x5fb   : > { %v977_v40 = vmax.f32 %v973_v36, 0.0  ;;  %v978_v41 = vmax.f32 %v974_v37, 0.0  ;;  %v979_v42 = vmax.f32 %v975_v38, 0.0  ;;  %v980_v43 = vmax.f32 %v976_v39, 0.0 }
 0x5fd   : > { %v981_v44 = vpack.c.bf16 %v978_v41, %v977_v40  ;;  %v982_v45 = vpack.c.bf16 %v980_v43, %v979_v42 }
 0x5ff   : > { %1394 = vmatprep.mubr.bf16.mxu1 %v981_v44 }
 0x600   : > { %1395 = vmatmul.mubr.bf16.vlgmr.msra.gmra.mrb[0].mxu1 %v982_v45 }
 0x6d3   : > { %v1396_v48 = vpop.f32.mrb[0].mxu1 }
 0x6d4   : > { %v1094_v49 = vadd.f32 %v1396_v48, %v1002_v47  ;;  %v1085_v50 = vpop.f32.mrb[1].mxu1 }
 0x6d5   : > { %v1086_v51 = vadd.f32 %v1085_v50, %v1002_v47  ;;  %v1397_v52 = vpop.f32.mrb[2].mxu1 }
 0x6d6   : > { %1102 = vst [vmem:[#allocation14 + $0x10] sm:$0xff] %v1094_v49  ;;  %v1097_v53 = vadd.f32 %v1397_v52, %v1002_v47  ;;  %v1088_v54 = vpop.f32.mrb[3].mxu1 }
 0x6d7   : > { %1100 = vst [vmem:[#allocation14] sm:$0xff] %v1086_v51  ;;  %v1089_v55 = vadd.f32 %v1088_v54, %v1002_v47 }
 0x6d8   : > { %1103 = vst [vmem:[#allocation14 + $0x18] sm:$0xff] %v1097_v53 }
 0x6d9   : > { %1101 = vst [vmem:[#allocation14 + $0x8] sm:$0xff] %v1089_v55 }
 0x6da PF: > { %p1446_p9 = scmp.eq.s32.totalorder %s1870_s0, 3  ;;  %s1790_s20 = smov [#allocation14]  }
 0x6db   : > { %s1110_s18 = sshll.u32 %s1790_s20, 4  ;;  %s1111_s18 = int_to_ptr.vmem [resolvable:$true] %s1110_s18 }
 0x6dc   : > { %s1674_s24 = scalar_lea.vmem %s1111_s18, 512  ;;  %p1681_p12 = scmp.lt.s32.totalorder %s1111_s18, %s1111_s18 }
 0x6dd   : > { %p1675_p10 = scmp.ne.s32.totalorder %s1111_s18, %s1674_s24  ;;  %p1682_p13 = scmp.lt.s32.totalorder %s1674_s24, %s1674_s24 }
 0x6df   : > { %p1676_p8 = pnand %p1675_p10, %p1446_p9  ;;  %p1683_p0 = por %p1682_p13, %p1681_p12 }
 0x6e1   : > { %p1677_p11 = pneg %p1676_p8 }
 0x6e3   : > { %p1684_p2 = pnand %p1683_p0, %p1677_p11 }
 0x6e5   : > { %1687 = shalt.err (!%p1684_p2)
}
 0x6e6   : > { %s2243_s19 = sld [smem:[#allocation21_spill]] }
 0x6ec   : > { %s1688_s23 = scalar_lea.hbm %s2243_s19, 512 }
 0x6ed   : > { %p1689_p7 = scmp.ne.s32.totalorder %s2243_s19, %s1688_s23  ;;  %p1694_p3 = scmp.lt.u32.totalorder %s1688_s23, %s2243_s19 }
 0x6ef   : > { %p1690_p4 = pnand %p1689_p7, %p1446_p9 }
 0x6f1   : > { %p1691_p5 = pneg %p1690_p4 }
 0x6f3   : > { %p1696_p1 = pnand %p1694_p3, %p1691_p5 }
 0x6f5   : > { %1699 = shalt.err (!%p1696_p1)
}
 0x6f6   : > { %s1791_s12 = smov 128   ;;  %s1792_s26 = smov 8  }
 0x6f7   : > { %1417 = dma.vmem_to_hbm [thread:$0]  (%p1446_p9), %s1111_s18, 512, %s2243_s19, [#allocation6], %s1791_s12, %s1791_s12, %s1792_s26  }
 0x6f8   : > { %1745 = dma.done.wait (%p1446_p9), [#allocation6], 512  }
 0x6f9   : > { %1747 = vsyncadd (%p1446_p9), [#allocation6], 4294966784 }
 0x6fa PF: > { %p25_p6 = scmp.ge.s32.totalorder %s1985_s11, 6   ;;  %s2244_s15 = smov %s1754_s16 }
 0x6fb   : > { %s2245_s16 = smov %s1758_s17  ;;  %s2246_s17 = smov %s1996_s27 }
 0x6fc   : > { %s2247_s18 = smov %s1985_s11  ;;  %27 = sbr.rel (!%p25_p6) target bundleno = 10 (0xa), region = 164 }
 0x703   :  { %1126 = vsyncpa [#allocation5], 1 }
 0x704   :  { %1128 = vsyncpa [#allocation5 + $0x1], 1 }
 0x705   :  { %1129 = vsyncpa [#allocation10], 1 }
 0x706   :  { %1131 = vsyncpa [#allocation10 + $0x1], 1 }
 0x707   :  { %1132 = vsyncpa [#allocation13], 1 }
 0x708   :  { %1133 = vsyncpa [#allocation6], 1 }
 0x709   :  { %1135 = vsyncpa [#allocation6 + $0x1], 1 }
 0x70a   :  { %1136 = vsyncpa [#allocation7], 1 }
 0x70b   :  { %1138 = vsyncpa [#allocation7 + $0x1], 1 }

</bundles_post_ra>
